<compile_context>
chip_gen: v7x
topology: tpu7x:2x2x1
jax: 0.10.0
libtpu: 0.0.40
codegen_flags: <defaults>
</compile_context>

<pallas_src>
import jax
import jax.numpy as jnp
from jax.experimental import pallas as pl
from jax.experimental.pallas import tpu as pltpu


def _mlp_kernel(xT_ref, w1_ref, b1_ref, w2_ref, b2_ref, oT_ref):
    # xT: (n_x, TB) — batch on the lane axis.
    # w1: (H, n_x), b1: (H, 1), w2: (n_y, H), b2: (n_y, 1)  (PyTorch layout).
    h = jnp.tanh(
        jnp.dot(w1_ref[...], xT_ref[...], preferred_element_type=jnp.float32)
        + b1_ref[...]
    )
    y = jnp.dot(w2_ref[...], h, preferred_element_type=jnp.float32) + b2_ref[...]
    oT_ref[...] = y.astype(oT_ref.dtype)   # (n_y, TB): lane-dense store


def neural_output_forward(x, w1, b1, w2, b2):
    """x: (B, n_x) f32.  w1: (H, n_x), b1: (H, 1), w2: (n_y, H), b2: (n_y, 1).

    Returns y: (B, n_y), identical to tanh(x @ w1.T + b1.T) @ w2.T + b2.T.
    """
    B, n_x = x.shape
    n_y, H = w2.shape

    # Batch tile on the lane axis; lane-dense (multiple of 128) whenever B >= 128,
    # otherwise a single full-extent block (allowed by the (8,128) rule).
    if B >= 128:
        tb = min(512, (B // 128) * 128)
    else:
        tb = B
    grid = (pl.cdiv(B, tb),)

    # Feature-major presentation for the kernel; transpose back outside.
    xT = x.T  # (n_x, B)

    resident = lambda shape: pl.BlockSpec(shape, lambda i: (0,) * len(shape))

    yT = pl.pallas_call(
        _mlp_kernel,
        out_shape=jax.ShapeDtypeStruct((n_y, B), x.dtype),
        grid=grid,
        in_specs=[
            pl.BlockSpec((n_x, tb), lambda i: (0, i)),  # batch-tiled input
            resident(w1.shape),                         # weights stay resident
            resident(b1.shape),
            resident(w2.shape),
            resident(b2.shape),
        ],
        out_specs=pl.BlockSpec((n_y, tb), lambda i: (0, i)),
        compiler_params=pltpu.CompilerParams(
            dimension_semantics=("parallel",),          # megacore on v7x
        ),
    )(xT, w1, b1, w2, b2)

    return yT.T  # (B, n_y)


def init_neural_output_params(key, n_x, n_y, hidden_size=16):
    """Deterministic init matching nn.Linear's U(-1/sqrt(fan_in), 1/sqrt(fan_in)).

    Weights are stored in PyTorch layout (out_features, in_features); biases as
    (out_features, 1) column vectors so they broadcast over the lane (batch) axis.
    """
    k1, k2, k3, k4 = jax.random.split(key, 4)
    bound1 = 1.0 / jnp.sqrt(n_x)
    bound2 = 1.0 / jnp.sqrt(hidden_size)
    w1 = jax.random.uniform(k1, (hidden_size, n_x), jnp.float32, -bound1, bound1)
    b1 = jax.random.uniform(k2, (hidden_size, 1), jnp.float32, -bound1, bound1)
    w2 = jax.random.uniform(k3, (n_y, hidden_size), jnp.float32, -bound2, bound2)
    b2 = jax.random.uniform(k4, (n_y, 1), jnp.float32, -bound2, bound2)
    return w1, b1, w2, b2


if __name__ == "__main__":
    # Shapes implied by the module: state dim n_x, output dim n_y, hidden 16.
    # Batch chosen >= 128 so the lane-dense / tiled path is exercised (grid of 2).
    batch, n_x, n_y, hidden = 1024, 4, 3, 16

    key = jax.random.PRNGKey(0)
    kx, kp = jax.random.split(key)
    x = jax.random.normal(kx, (batch, n_x), jnp.float32)
    w1, b1, w2, b2 = init_neural_output_params(kp, n_x, n_y, hidden)

    y = neural_output_forward(x, w1, b1, w2, b2)
    y = jax.block_until_ready(y)

    # Pure-JAX reference of the PyTorch forward pass.
    y_ref = jnp.tanh(x @ w1.T + b1.T) @ w2.T + b2.T
    assert y.shape == (batch, n_y)
    assert jnp.allclose(y, y_ref, atol=1e-5, rtol=1e-5)

    print("KERNEL_OK")
</pallas_src>

<mosaic_0001>
module attributes {stable_mosaic.version = 11 : i64} {
  func.func @_mlp_kernel(%arg0: i32, %arg1: memref<4x512xf32, #tpu.memory_space<vmem>>, %arg2: memref<16x4xf32, #tpu.memory_space<vmem>>, %arg3: memref<16x1xf32, #tpu.memory_space<vmem>>, %arg4: memref<3x16xf32, #tpu.memory_space<vmem>>, %arg5: memref<3x1xf32, #tpu.memory_space<vmem>>, %arg6: memref<3x512xf32, #tpu.memory_space<vmem>>) attributes {dimension_semantics = [#tpu.dimension_semantics<parallel>], iteration_bounds = array<i64: 2>, scalar_prefetch = 0 : i64, scratch_operands = 0 : i64, tpu.core_type = #tpu.core_type<tc>, window_params = [{transform_indices = @transform_0, window_bounds = array<i64: 4, 512>}, {pipeline_mode = #tpu.pipeline_mode<synchronous>, transform_indices = @transform_1, window_bounds = array<i64: 16, 4>}, {pipeline_mode = #tpu.pipeline_mode<synchronous>, transform_indices = @transform_2, window_bounds = array<i64: 16, 1>}, {pipeline_mode = #tpu.pipeline_mode<synchronous>, transform_indices = @transform_3, window_bounds = array<i64: 3, 16>}, {pipeline_mode = #tpu.pipeline_mode<synchronous>, transform_indices = @transform_4, window_bounds = array<i64: 3, 1>}, {transform_indices = @transform_5, window_bounds = array<i64: 3, 512>}]} {
    %c0 = arith.constant 0 : index
    %c0_0 = arith.constant 0 : index
    %0 = vector.load %arg2[%c0, %c0_0] : memref<16x4xf32, #tpu.memory_space<vmem>>, vector<16x4xf32>
    %c0_1 = arith.constant 0 : index
    %c0_2 = arith.constant 0 : index
    %1 = vector.load %arg1[%c0_1, %c0_2] : memref<4x512xf32, #tpu.memory_space<vmem>>, vector<4x512xf32>
    %cst = arith.constant dense<0.000000e+00> : vector<16x512xf32>
    %2 = tpu.matmul %0, %1, %cst {dimension_numbers = #tpu.dot_dimension_numbers<[1], [0], [0], [1], [0, 0, 1, 1], [], []>} : vector<16x4xf32>, vector<4x512xf32>, vector<16x512xf32> -> vector<16x512xf32>
    %c0_3 = arith.constant 0 : index
    %c0_4 = arith.constant 0 : index
    %3 = vector.load %arg3[%c0_3, %c0_4] : memref<16x1xf32, #tpu.memory_space<vmem>>, vector<16x1xf32>
    %4 = vector.broadcast %3 : vector<16x1xf32> to vector<16x512xf32>
    %5 = arith.addf %2, %4 : vector<16x512xf32>
    %6 = math.tanh %5 : vector<16x512xf32>
    %c0_5 = arith.constant 0 : index
    %c0_6 = arith.constant 0 : index
    %7 = vector.load %arg4[%c0_5, %c0_6] : memref<3x16xf32, #tpu.memory_space<vmem>>, vector<3x16xf32>
    %cst_7 = arith.constant dense<0.000000e+00> : vector<3x512xf32>
    %8 = tpu.matmul %7, %6, %cst_7 {dimension_numbers = #tpu.dot_dimension_numbers<[1], [0], [0], [1], [0, 0, 1, 1], [], []>} : vector<3x16xf32>, vector<16x512xf32>, vector<3x512xf32> -> vector<3x512xf32>
    %c0_8 = arith.constant 0 : index
    %c0_9 = arith.constant 0 : index
    %9 = vector.load %arg5[%c0_8, %c0_9] : memref<3x1xf32, #tpu.memory_space<vmem>>, vector<3x1xf32>
    %10 = vector.broadcast %9 : vector<3x1xf32> to vector<3x512xf32>
    %11 = arith.addf %8, %10 : vector<3x512xf32>
    %c0_10 = arith.constant 0 : index
    %c0_11 = arith.constant 0 : index
    %12 = vector.load %arg6[%c0_10, %c0_11] : memref<3x512xf32, #tpu.memory_space<vmem>>, vector<3x512xf32>
    tpu.vector_store %arg6[%c0_10, %c0_11], %11 {strides = array<i32>} : memref<3x512xf32, #tpu.memory_space<vmem>>, vector<3x512xf32>,
    return
  }
  func.func @transform_0(%arg0: i32) -> (i32, i32) {
    %c0_i32 = arith.constant 0 : i32
    %c0_i32_0 = arith.constant 0 : i32
    return %c0_i32, %arg0 : i32, i32
  }
  func.func @transform_1(%arg0: i32) -> (i32, i32) {
    %c0_i32 = arith.constant 0 : i32
    %c0_i32_0 = arith.constant 0 : i32
    %c0_i32_1 = arith.constant 0 : i32
    return %c0_i32, %c0_i32_0 : i32, i32
  }
  func.func @transform_2(%arg0: i32) -> (i32, i32) {
    %c0_i32 = arith.constant 0 : i32
    %c0_i32_0 = arith.constant 0 : i32
    %c0_i32_1 = arith.constant 0 : i32
    return %c0_i32, %c0_i32_0 : i32, i32
  }
  func.func @transform_3(%arg0: i32) -> (i32, i32) {
    %c0_i32 = arith.constant 0 : i32
    %c0_i32_0 = arith.constant 0 : i32
    %c0_i32_1 = arith.constant 0 : i32
    return %c0_i32, %c0_i32_0 : i32, i32
  }
  func.func @transform_4(%arg0: i32) -> (i32, i32) {
    %c0_i32 = arith.constant 0 : i32
    %c0_i32_0 = arith.constant 0 : i32
    %c0_i32_1 = arith.constant 0 : i32
    return %c0_i32, %c0_i32_0 : i32, i32
  }
  func.func @transform_5(%arg0: i32) -> (i32, i32) {
    %c0_i32 = arith.constant 0 : i32
    %c0_i32_0 = arith.constant 0 : i32
    return %c0_i32, %arg0 : i32, i32
  }
}

</mosaic_0001>

<bundles_post_ra>
// kernel: tpu_custom_call.1
= control target key start
LH: loop header
LB: loop body
LE: loop exit
PB: predicated region body
PF: predicated region fallthrough
CT: control target
= control target key end

     0   :  { %10 = vsyncpa [#allocation3], 0  ;;  %s967_s0 = inlined_call_operand.vmem [shape: f32[4,1024], index: 0, kind: input, shape index: {}]   ;;  %s968_s1 = inlined_call_operand.vmem [shape: f32[16,4], index: 1, kind: input, shape index: {}]   ;;  %s969_s2 = inlined_call_operand.vmem [shape: f32[16,1], index: 2, kind: input, shape index: {}]   ;;  %s970_s3 = inlined_call_operand.vmem [shape: f32[3,16], index: 3, kind: input, shape index: {}]   ;;  %s971_s4 = inlined_call_operand.vmem [shape: f32[3,1], index: 4, kind: input, shape index: {}]   ;;  %s972_s5 = inlined_call_operand.hbm [shape: f32[3,1024], index: 5, kind: output, shape index: {}]  }
   0x1   :  { %12 = vsyncpa [#allocation3 + $0x1], 0  ;;  %s850_s18 = smov 0   ;;  %s852_s19 = smov 0  }
   0x2   :  { %s854_s20 = smov 0   ;;  %s856_s21 = smov 0  }
   0x3 LB: > { %s871_s22 = sadd.s32 4294967295, %s815_s21   ;;  %s661_s23 = sadd.s32 4294967294, %s815_s21   ;;  %s815_s21 = sphi %s856_s21, %s978_s21   ;;  %s811_s20 = sphi %s854_s20, %s977_s20   ;;  %s807_s19 = sphi %s852_s19, %s976_s19   ;;  %s803_s18 = sphi %s850_s18, %s975_s18  }
   0x4   : > { %s875_s24 = sadd.s32 1, %s815_s21   ;;  %s135_s25 = sadd.s32 1, %s811_s20 }
   0x5   : > { %s132_s26 = ssub.s32 %s815_s21, %s875_s24  ;;  %p145_p0 = scmp.ne.s32.totalorder %s811_s20, %s807_s19 }
   0x6   : > { %p133_p1 = scmp.eq.s32.totalorder %s132_s26, 0  ;;  %p146_p2 = scmp.eq.s32.totalorder %s871_s22, 1 }
   0x7   : > { %p151_p3 = scmp.ne.s32.totalorder %s807_s19, %s803_s18  ;;  %p152_p4 = scmp.eq.s32.totalorder %s661_s23, 1 }
   0x8   : > { %s886_s27 = scalar_select %p133_p1, %s811_s20, %s135_s25  }
   0x9   : > { %p888_p5 = por %p146_p2, %p145_p0  ;;  %p892_p6 = por %p152_p4, %p151_p3 }
   0xa   : > { %p664_p7 = scmp.ge.s32.totalorder %s815_s21, 1  ;;  %p191_p8 = scmp.lt.s32.totalorder %s815_s21, 3 }
   0xc   : > { %p192_p9 = pnand %p664_p7, %p191_p8 }
   0xd   : > { %s666_s30 = sshll.u32 (!%p192_p9), %s871_s22, 2  ;;  %v817_v0 = vmov (!%p192_p9), 0.0   ;;  %v230_v1 = vld [vmem:[%s969_s2] sm:$0xff] (!%p192_p9)  ;;  %v818_v2 = vmov (!%p192_p9), 0   ;;  %v231_v3 = vld [vmem:[%s969_s2 + $0x8] sm:$0xff] (!%p192_p9)  ;;  %vm253_vm0 = vcmask (!%p192_p9), 1043456  }
   0xe   : > { %195 = sbr.rel (%p192_p9) target bundleno = 498 (0x1f2), region = 40  ;;  %p220_p10 = scmp.lt.s32.totalorder (!%p192_p9), %s666_s30, 7  ;;  %326 = vmatprep.mubr.f32.mxu0 (!%p192_p9), %v817_v0  ;;  %403 = vmatprep.mubr.f32.mxu1 (!%p192_p9), %v817_v0  ;;  %v226_v8 = vld [vmem:[%s968_s1] sm:$0xff] (!%p192_p9)  ;;  %vm246_vm1 = vcmask (!%p192_p9), 31744   ;;  %v227_v9 = vld [vmem:[%s968_s1 + $0x8] sm:$0xff] (!%p192_p9)  ;;  %vm431_vm2 = vcmask (!%p192_p9), 130048  }
   0xf   : > { %733 = vset.pattern.permute.xlu0 (!%p192_p9), %v818_v2  ;;  %734 = vset.pattern.permute.xlu1 (!%p192_p9), %v818_v2  ;;  %v425_v10 = vld [vmem:[%s971_s4] sm:$0x7] (!%p192_p9)  ;;  %s216_s6 = sand.u32 (!%p192_p9), 1, %s807_s19   ;;  %s683_s8 = sshll.u32 (!%p192_p9), %s871_s22, 8 }
  0x10   : > { %234 = vperm.xlu0 (!%p192_p9), %733, %v230_v1   ;;  %428 = vperm.xlu1 (!%p192_p9), %734, %v425_v10   ;;  %v424_v41 = vld [vmem:[%s970_s3] sm:$0x7] (!%p192_p9)  ;;  %s665_s7 = sshll.u32 (!%p192_p9), %s216_s6, 4  ;;  %s588_s14 = scalar_lea.sflag (!%p192_p9), [#allocation3], %s216_s6 }
  0x11   : > { %s218_s9 = scalar_lea.vmem (!%p192_p9), [#allocation2], %s665_s7  ;;  %s819_s22 = smov (!%p192_p9), [#allocation2]  }
  0x12   : > { %s757_s16 = sshll.u32 (!%p192_p9), %s819_s22, 4  ;;  %s758_s16 = int_to_ptr.vmem [resolvable:$false] %s757_s16 }
  0x13   : > { %s759_s17 = scalar_lea.vmem (!%p192_p9), %s758_s16, 512 }
  0x14   : > { %239 = vperm.xlu0 (!%p192_p9), %733, %v231_v3  }
  0x15   : > { %s980_s30 = smov (!%p220_p10, %s666_s30), 7 }
  0x16   : > { %s667_s10 = sshll.u32 %s980_s30, 2 }
  0x17   : > { %s223_s13 = scalar_lea.vmem %s967_s0, %s667_s10  ;;  %s602_s10 = sshll.u32 %s218_s9, 4  ;;  %s927_s10 = int_to_ptr.vmem [resolvable:$true] %s602_s10 }
  0x18   : > { %v228_v4 = vld [vmem:[%s223_s13] sm:$0xff]  ;;  %v229_v5 = vld [vmem:[%s223_s13 + $0x8] sm:$0xff]  ;;  %s925_s13 = scalar_lea.hbm %s972_s5, %s683_s8  ;;  %s753_s15 = scalar_lea.vmem %s927_s10, 256 }
  0x19   : > { %v244_v6 = vcombine.high %v228_v4, %v228_v4  ;;  %v245_v7 = vcombine.high %v229_v5, %v229_v5  ;;  %p754_p11 = scmp.ne.s32.totalorder %s927_s10, %s753_s15  ;;  %p760_p0 = scmp.lt.s32.totalorder %s927_s10, %s758_s16 }
  0x1a   : > { %p761_p1 = scmp.lt.s32.totalorder %s759_s17, %s753_s15 }
  0x1b   : > { %668 = vmatprep.subr.msk.mxu0 %vm253_vm0, %v244_v6  ;;  %672 = vmatprep.subr.msk.mxu1 %vm253_vm0, %v245_v7  ;;  %p755_p12 = pnand %p754_p11, %p888_p5 }
  0x1c   : > { %669 = vmatpush1.msk.msra.mxu0 %vm253_vm0, %v228_v4  ;;  %673 = vmatpush1.msk.msra.mxu1 %vm253_vm0, %v229_v5  ;;  %p762_p2 = por %p761_p1, %p760_p0 }
  0x1d   : > { %670 = vmatmul.mubr.msk.f32.vlgmr.msra.gmra.mrb[0].mxu0 %vm246_vm1, %v226_v8  ;;  %674 = vmatmul.mubr.msk.f32.vlgmr.msra.gmra.mrb[0].mxu1 %vm246_vm1, %v226_v8  ;;  %p756_p13 = pneg %p755_p12 }
  0x1e   : > { %332 = vmatprep.mubr.f32.mxu0 %v817_v0  ;;  %409 = vmatprep.mubr.f32.mxu1 %v817_v0 }
  0x1f   : > { %p763_p3 = pnand %p762_p2, %p756_p13 }
  0x21   : > { %671 = vmatmul.mubr.msk.f32.gmra.mrb[2].mxu0 %vm246_vm1, %v227_v9  ;;  %675 = vmatmul.mubr.msk.f32.gmra.mrb[2].mxu1 %vm246_vm1, %v227_v9 }
  0x22   : > { %499 = vmatprep.mubr.f32.mxu0 %v817_v0  ;;  %570 = vmatprep.mubr.f32.mxu1 %v817_v0 }
  0x8f   : > { %v235_v11 = vpop.permute.xlu0 %234  ;;  %v429_v42 = vpop.permute.xlu1 %428 }
  0x93   : > { %v240_v20 = vpop.permute.xlu0 %239 }
  0xf0   : > { %v328_v12 = vpop.f32.mrb[0].mxu0  ;;  %v405_v13 = vpop.f32.mrb[0].mxu1 }
  0xf1   : > { %v329_v14 = vadd.f32 %v328_v12, %v235_v11  ;;  %v406_v15 = vadd.f32 %v405_v13, %v235_v11  ;;  %v330_v16 = vpop.f32.mrb[1].mxu0  ;;  %v407_v17 = vpop.f32.mrb[1].mxu1 }
  0xf2   : > { %v331_v18 = vadd.f32 %v330_v16, %v235_v11  ;;  %v408_v19 = vadd.f32 %v407_v17, %v235_v11 }
  0xf3   : > { %737 = vtanh.f32 %v329_v14 }
  0xf4   : > { %739 = vtanh.f32 %v406_v15  ;;  %v334_v21 = vpop.f32.mrb[2].mxu0  ;;  %v411_v22 = vpop.f32.mrb[2].mxu1 }
  0xf5   : > { %741 = vtanh.f32 %v331_v18  ;;  %v335_v23 = vadd.f32 %v334_v21, %v240_v20  ;;  %v412_v24 = vadd.f32 %v411_v22, %v240_v20  ;;  %v336_v25 = vpop.f32.mrb[3].mxu0  ;;  %v413_v26 = vpop.f32.mrb[3].mxu1 }
  0xf6   : > { %743 = vtanh.f32 %v408_v19  ;;  %v337_v27 = vadd.f32 %v336_v25, %v240_v20  ;;  %v414_v28 = vadd.f32 %v413_v26, %v240_v20 }
  0xf7   : > { %745 = vtanh.f32 %v335_v23 }
  0xf8   : > { %747 = vtanh.f32 %v412_v24 }
  0xf9   : > { %749 = vtanh.f32 %v337_v27 }
  0xfa   : > { %751 = vtanh.f32 %v414_v28 }
  0xfd   : > { %v738_v29 = vpop.eup %737 }
  0xfe   : > { %v740_v30 = vpop.eup %739 }
  0xff   : > { %v742_v31 = vpop.eup %741 }
 0x100   : > { %v744_v32 = vpop.eup %743 }
 0x101   : > { %v746_v33 = vpop.eup %745 }
 0x102   : > { %v748_v34 = vpop.eup %747  ;;  %v686_v35 = vpack.c.bf16 %v746_v33, %v738_v29 }
 0x103   : > { %v750_v36 = vpop.eup %749  ;;  %v690_v37 = vpack.c.bf16 %v748_v34, %v740_v30 }
 0x104   : > { %v752_v38 = vpop.eup %751  ;;  %v684_v39 = vpack.c.bf16 %v750_v36, %v742_v31 }
 0x105   : > { %v688_v40 = vpack.c.bf16 %v752_v38, %v744_v32 }
 0x106   : > { %685 = vmatprep.subr.bf16.mxu0 %v684_v39 }
 0x107   : > { %689 = vmatprep.subr.bf16.mxu1 %v688_v40  ;;  %687 = vmatpush1.bf16.msra.mxu0 %v686_v35 }
 0x108   : > { %691 = vmatpush1.bf16.msra.mxu1 %v690_v37 }
 0x10a   : > { %676 = vmatmul.mubr.msk.f32.vlgmr.msra.gmra.mrb[4].mxu0 %vm431_vm2, %v424_v41 }
 0x10b   : > { %677 = vmatmul.mubr.msk.f32.vlgmr.msra.gmra.mrb[4].mxu1 %vm431_vm2, %v424_v41 }
 0x1dd   : > { %v501_v43 = vpop.f32.mrb[4].mxu0 }
 0x1de   : > { %v572_v44 = vpop.f32.mrb[4].mxu1  ;;  %v502_v45 = vadd.f32 %v501_v43, %v429_v42  ;;  %v503_v46 = vpop.f32.mrb[5].mxu0 }
 0x1df   : > { %v573_v47 = vadd.f32 %v572_v44, %v429_v42  ;;  %v504_v48 = vadd.f32 %v503_v46, %v429_v42  ;;  %v574_v49 = vpop.f32.mrb[5].mxu1 }
 0x1e0   : > { %v575_v50 = vadd.f32 %v574_v49, %v429_v42 }
 0x1e1   : > { %v581_v51 = vcombine.low %v502_v45, %v504_v48 }
 0x1e2   : > { %v582_v52 = vcombine.low %v573_v47, %v575_v50 }
 0x1e3   : > { %585 = vst [vmem:[%s218_s9] sm:$0x77] %v581_v51 }
 0x1e4   : > { %586 = vst [vmem:[%s218_s9 + $0x8] sm:$0x77] %v582_v52 }
 0x1e5   : > { %766 = shalt.err (!%p763_p3)
}
 0x1e6   : > { %s767_s23 = scalar_lea.hbm %s925_s13, 256  ;;  %s771_s30 = scalar_lea.hbm %s972_s5, 512 }
 0x1e7   : > { %p768_p4 = scmp.ne.s32.totalorder %s925_s13, %s767_s23  ;;  %p772_p9 = scmp.lt.u32.totalorder %s925_s13, %s972_s5 }
 0x1e8   : > { %p773_p10 = scmp.lt.u32.totalorder %s771_s30, %s767_s23  ;;  %p775_p12 = scmp.lt.u32.totalorder %s767_s23, %s925_s13 }
 0x1e9   : > { %p769_p7 = pnand %p768_p4, %p888_p5 }
 0x1ea   : > { %p774_p11 = por %p773_p10, %p772_p9 }
 0x1eb   : > { %p770_p8 = pneg %p769_p7 }
 0x1ec   : > { %p776_p13 = por %p775_p12, %p774_p11 }
 0x1ee   : > { %p777_p0 = pnand %p776_p13, %p770_p8 }
 0x1f0   : > { %780 = shalt.err (!%p777_p0)
}
 0x1f1   : > { %692 = dma.vmem_to_hbm [thread:$0]  (%p888_p5), %s927_s10, 256, %s925_s13, %s588_s14  }
 0x1f2 PF: > { %p698_p1 = scmp.ge.s32.totalorder %s815_s21, 2  ;;  %s614_s8 = sand.u32 1, %s803_s18  }
 0x1f3   : > { %s615_s9 = scalar_lea.sflag [#allocation3], %s614_s8 }
 0x1f4   : > { %p695_p2 = pnand %p698_p1, %p892_p6 }
 0x1f6   : > { %798 = dma.done.wait (!%p695_p2), %s615_s9, 256  }
 0x1f7   : > { %800 = vsyncadd (!%p695_p2), %s615_s9, 4294967040  ;;  %p15_p3 = scmp.ge.s32.totalorder %s875_s24, 4   ;;  %s975_s18 = smov %s807_s19 }
 0x1f8   : > { %s976_s19 = smov %s811_s20  ;;  %s977_s20 = smov %s886_s27 }
 0x1f9   : > { %s978_s21 = smov %s875_s24  ;;  %17 = sbr.rel (!%p15_p3) target bundleno = 3 (0x3), region = 75 }
 0x200   :  { %620 = vsyncpa [#allocation3], 1 }
 0x201   :  { %622 = vsyncpa [#allocation3 + $0x1], 1 }

</bundles_post_ra>
